<compile_context>
chip_gen: v7x
topology: tpu7x:2x2x1
jax: 0.10.0
libtpu: 0.0.40
codegen_flags: <defaults>
</compile_context>

<pallas_src>
import jax
import jax.numpy as jnp
import numpy as np
from jax import lax
from jax.experimental import pallas as pl
from jax.experimental.pallas import tpu as pltpu

KEYS = ["Tempo", "Bar", "Position", "Token", "Duration"]


def _round_up(x, m):
    return ((x + m - 1) // m) * m


def _prolongation_kernel(ids_ref, tab_ref, bias_ref, out_ref):
    """One grid step over TILE_N rows.

    ids_ref  : (TILE_N, 8) int32  -- cols 0..4 are offset ids, 5..7 are -1 pad
    tab_ref  : (V_pad, D)  f32    -- concatenated projected tables (resident)
    bias_ref : (1, D)      f32    -- projection bias (resident)
    out_ref  : (TILE_N, D) f32
    """
    tn = out_ref.shape[0]
    v_pad = tab_ref.shape[0]

    ids = ids_ref[...]                                          # (tn, 8)
    iota = lax.broadcasted_iota(jnp.int32, (tn, v_pad), 1)      # (tn, V_pad)

    # Multi-hot over the concatenated vocabulary: each row has (up to) 5 ones,
    # one per key segment (segments are disjoint because of the offsets).
    mh = jnp.zeros((tn, v_pad), jnp.float32)
    for k in range(5):                                          # unrolled VPU
        mh = mh + (ids[:, k:k + 1] == iota).astype(jnp.float32)

    # Single fused lookup + projection matmul on the MXU.
    acc = jnp.dot(mh, tab_ref[...], preferred_element_type=jnp.float32)
    out_ref[...] = acc + bias_ref[...]


def prolongation_embedding_forward(Tempo, Bar, Position, Token, Duration,
                                   params, cond=False, tile_n=512):
    """Pallas forward pass matching ProlongationEmbedding.forward."""
    B, T = Tempo.shape
    N = B * T
    D = int(params["d_embed"])

    # ---- fold the Linear projection into the embedding tables (wrapper) ----
    if cond:
        W, b = params["enc_w"], params["enc_b"]                 # W: (D, 5*D)
    else:
        W, b = params["dec_w"], params["dec_b"]

    tables = [params["tables"][k] for k in KEYS]
    vocab_sizes = [int(t.shape[0]) for t in tables]
    proj_tabs = [
        tables[k].astype(jnp.float32) @ W[:, k * D:(k + 1) * D].T   # (V_k, D)
        for k in range(5)
    ]
    tab_cat = jnp.concatenate(proj_tabs, axis=0)                # (V_total, D)
    v_total = int(tab_cat.shape[0])
    v_pad = max(128, _round_up(v_total, 128))
    # TODO(synk): for very large vocabularies (v_pad >> 8k) switch to a
    # vocab-tiled or DMA-gather lookup instead of a (TILE_N, V_pad) one-hot.
    tab_cat = jnp.pad(tab_cat, ((0, v_pad - v_total), (0, 0)))
    bias2d = b.reshape(1, D).astype(jnp.float32)

    # ---- pack ids into one (N_pad, 8) int32 array with vocab offsets -------
    offsets = np.concatenate([[0], np.cumsum(vocab_sizes)])[:5]
    raw_ids = (Tempo, Bar, Position, Token, Duration)
    id_cols = [raw_ids[k].reshape(-1).astype(jnp.int32) + int(offsets[k])
               for k in range(5)]
    ids_mat = jnp.stack(id_cols, axis=1)                        # (N, 5)

    # ---- pick TILE_N: small cases stay small, large vocabs stay in VMEM ----
    tile_n = min(tile_n, _round_up(N, 8))
    # cap the (TILE_N, V_pad) f32 multi-hot at ~4 MiB
    mh_cap = max(8, (4 * 1024 * 1024) // (v_pad * 4))
    tile_n = max(8, min(tile_n, (mh_cap // 8) * 8))

    n_pad = _round_up(N, tile_n)
    ids_mat = jnp.pad(ids_mat, ((0, n_pad - N), (0, 3)),
                      constant_values=-1)                       # (N_pad, 8)

    grid = (n_pad // tile_n,)

    in_specs = [
        pl.BlockSpec((tile_n, 8), lambda i: (i, 0)),            # ids: tiled N
        pl.BlockSpec((v_pad, D), lambda i: (0, 0)),             # table: resident
        pl.BlockSpec((1, D), lambda i: (0, 0)),                 # bias: resident
    ]
    out_specs = pl.BlockSpec((tile_n, D), lambda i: (i, 0))

    cost = pl.CostEstimate(
        flops=2 * n_pad * v_pad * D + 5 * n_pad * v_pad,
        transcendentals=0,
        bytes_accessed=(n_pad * 8 * 4            # ids
                        + v_pad * D * 4          # table
                        + D * 4                  # bias
                        + n_pad * D * 4),        # output
    )

    out = pl.pallas_call(
        _prolongation_kernel,
        out_shape=jax.ShapeDtypeStruct((n_pad, D), jnp.float32),
        grid=grid,
        in_specs=in_specs,
        out_specs=out_specs,
        compiler_params=pltpu.CompilerParams(
            dimension_semantics=("parallel",),
            vmem_limit_bytes=32 * 1024 * 1024,
        ),
        cost_estimate=cost,
    )(ids_mat, tab_cat, bias2d)

    return out[:N].reshape(B, T, D)
    # TODO(synk): D=32 (<128) output stores are lane-masked; a lane-dense
    # (N*D/128, 128) output slab would need an in-kernel relayout -- skipped.


def make_params(key, vocab_sizes, d_embed, padding_idx_list):
    """Deterministic synthetic parameter init mirroring the PyTorch module."""
    keys = jax.random.split(key, len(KEYS) + 4)
    tables = {}
    for i, name in enumerate(KEYS):
        V = vocab_sizes[name]
        tab = jax.random.normal(keys[i], (V, d_embed), jnp.float32) * (
            d_embed ** -0.5)
        pad = padding_idx_list[i]
        if pad is not None:
            tab = tab.at[pad].set(0.0)   # padding row zeroed, as in PyTorch
        tables[name] = tab

    fan_in = len(KEYS) * d_embed
    bound = 1.0 / np.sqrt(fan_in)
    enc_w = jax.random.uniform(keys[5], (d_embed, fan_in), jnp.float32,
                               -bound, bound)
    enc_b = jax.random.uniform(keys[6], (d_embed,), jnp.float32, -bound, bound)
    dec_w = jax.random.uniform(keys[7], (d_embed, fan_in), jnp.float32,
                               -bound, bound)
    dec_b = jax.random.uniform(keys[8], (d_embed,), jnp.float32, -bound, bound)
    return {
        "d_embed": d_embed,
        "tables": tables,
        "enc_w": enc_w, "enc_b": enc_b,
        "dec_w": dec_w, "dec_b": dec_b,
    }


def reference_forward(Tempo, Bar, Position, Token, Duration, params, cond=False):
    """Pure-JAX reference matching the PyTorch forward semantics."""
    tabs = params["tables"]
    embeds = jnp.concatenate(
        [tabs["Tempo"][Tempo], tabs["Bar"][Bar], tabs["Position"][Position],
         tabs["Token"][Token], tabs["Duration"][Duration]], axis=-1)
    if cond:
        W, b = params["enc_w"], params["enc_b"]
    else:
        W, b = params["dec_w"], params["dec_b"]
    return embeds @ W.T + b


if __name__ == "__main__":
    # Small synthetic event2word_dict vocab sizes.
    vocab_sizes = {"Tempo": 16, "Bar": 8, "Position": 16,
                   "Token": 48, "Duration": 24}
    padding_idx_list = [0, 0, 0, 0, 0]
    d_embed = 32
    B, T = 2, 8

    root = jax.random.PRNGKey(0)
    pkey, ikey = jax.random.split(root)
    params = make_params(pkey, vocab_sizes, d_embed, padding_idx_list)

    ikeys = jax.random.split(ikey, len(KEYS))
    ids = {
        name: jax.random.randint(ikeys[i], (B, T), 0, vocab_sizes[name],
                                 dtype=jnp.int32)
        for i, name in enumerate(KEYS)
    }

    # Run both branches (cond=False -> dec proj, cond=True -> enc proj).
    out_dec = prolongation_embedding_forward(
        ids["Tempo"], ids["Bar"], ids["Position"], ids["Token"],
        ids["Duration"], params, cond=False)
    out_enc = prolongation_embedding_forward(
        ids["Tempo"], ids["Bar"], ids["Position"], ids["Token"],
        ids["Duration"], params, cond=True)
    jax.block_until_ready(out_dec)
    jax.block_until_ready(out_enc)

    ref_dec = reference_forward(ids["Tempo"], ids["Bar"], ids["Position"],
                                ids["Token"], ids["Duration"], params,
                                cond=False)
    ref_enc = reference_forward(ids["Tempo"], ids["Bar"], ids["Position"],
                                ids["Token"], ids["Duration"], params,
                                cond=True)

    assert out_dec.shape == (B, T, d_embed)
    assert out_enc.shape == (B, T, d_embed)
    # Folding the projection into the tables reorders the f32 summation
    # (per-key D-length dots vs one 5*D-length dot) -> tiny rounding deltas.
    np.testing.assert_allclose(np.asarray(out_dec), np.asarray(ref_dec),
                               rtol=1e-4, atol=1e-5)
    np.testing.assert_allclose(np.asarray(out_enc), np.asarray(ref_enc),
                               rtol=1e-4, atol=1e-5)
    print("KERNEL_OK")
</pallas_src>

<mosaic_0001>
module attributes {stable_mosaic.version = 11 : i64} {
  func.func @_prolongation_kernel(%arg0: i32, %arg1: memref<16x8xi32, #tpu.memory_space<vmem>>, %arg2: memref<128x32xf32, #tpu.memory_space<vmem>>, %arg3: memref<1x32xf32, #tpu.memory_space<vmem>>, %arg4: memref<16x32xf32, #tpu.memory_space<vmem>>) attributes {dimension_semantics = [#tpu.dimension_semantics<parallel>], iteration_bounds = array<i64: 1>, scalar_prefetch = 0 : i64, scratch_operands = 0 : i64, tpu.core_type = #tpu.core_type<tc>, window_params = [{transform_indices = @transform_0, window_bounds = array<i64: 16, 8>}, {pipeline_mode = #tpu.pipeline_mode<synchronous>, transform_indices = @transform_1, window_bounds = array<i64: 128, 32>}, {pipeline_mode = #tpu.pipeline_mode<synchronous>, transform_indices = @transform_2, window_bounds = array<i64: 1, 32>}, {transform_indices = @transform_3, window_bounds = array<i64: 16, 32>}]} {
    %c0 = arith.constant 0 : index
    %c0_0 = arith.constant 0 : index
    %0 = vector.load %arg1[%c0, %c0_0] : memref<16x8xi32, #tpu.memory_space<vmem>>, vector<16x8xi32>
    %1 = tpu.iota {dimensions = array<i32: 1>} : vector<16x128xi32>
    %cst = arith.constant 0.000000e+00 : f32
    %2 = vector.broadcast %cst : f32 to vector<16x128xf32>
    %3 = vector.extract_strided_slice %0 {offsets = [0, 0], sizes = [16, 1], strides = [1, 1]} : vector<16x8xi32> to vector<16x1xi32>
    %4 = vector.broadcast %3 : vector<16x1xi32> to vector<16x128xi32>
    %5 = arith.cmpi eq, %4, %1 : vector<16x128xi32>
    %6 = arith.extui %5 : vector<16x128xi1> to vector<16x128xi32>
    %7 = arith.sitofp %6 : vector<16x128xi32> to vector<16x128xf32>
    %8 = arith.addf %2, %7 : vector<16x128xf32>
    %9 = vector.extract_strided_slice %0 {offsets = [0, 1], sizes = [16, 1], strides = [1, 1]} : vector<16x8xi32> to vector<16x1xi32>
    %10 = vector.broadcast %9 : vector<16x1xi32> to vector<16x128xi32>
    %11 = arith.cmpi eq, %10, %1 : vector<16x128xi32>
    %12 = arith.extui %11 : vector<16x128xi1> to vector<16x128xi32>
    %13 = arith.sitofp %12 : vector<16x128xi32> to vector<16x128xf32>
    %14 = arith.addf %8, %13 : vector<16x128xf32>
    %15 = vector.extract_strided_slice %0 {offsets = [0, 2], sizes = [16, 1], strides = [1, 1]} : vector<16x8xi32> to vector<16x1xi32>
    %16 = vector.broadcast %15 : vector<16x1xi32> to vector<16x128xi32>
    %17 = arith.cmpi eq, %16, %1 : vector<16x128xi32>
    %18 = arith.extui %17 : vector<16x128xi1> to vector<16x128xi32>
    %19 = arith.sitofp %18 : vector<16x128xi32> to vector<16x128xf32>
    %20 = arith.addf %14, %19 : vector<16x128xf32>
    %21 = vector.extract_strided_slice %0 {offsets = [0, 3], sizes = [16, 1], strides = [1, 1]} : vector<16x8xi32> to vector<16x1xi32>
    %22 = vector.broadcast %21 : vector<16x1xi32> to vector<16x128xi32>
    %23 = arith.cmpi eq, %22, %1 : vector<16x128xi32>
    %24 = arith.extui %23 : vector<16x128xi1> to vector<16x128xi32>
    %25 = arith.sitofp %24 : vector<16x128xi32> to vector<16x128xf32>
    %26 = arith.addf %20, %25 : vector<16x128xf32>
    %27 = vector.extract_strided_slice %0 {offsets = [0, 4], sizes = [16, 1], strides = [1, 1]} : vector<16x8xi32> to vector<16x1xi32>
    %28 = vector.broadcast %27 : vector<16x1xi32> to vector<16x128xi32>
    %29 = arith.cmpi eq, %28, %1 : vector<16x128xi32>
    %30 = arith.extui %29 : vector<16x128xi1> to vector<16x128xi32>
    %31 = arith.sitofp %30 : vector<16x128xi32> to vector<16x128xf32>
    %32 = arith.addf %26, %31 : vector<16x128xf32>
    %c0_1 = arith.constant 0 : index
    %c0_2 = arith.constant 0 : index
    %33 = vector.load %arg2[%c0_1, %c0_2] : memref<128x32xf32, #tpu.memory_space<vmem>>, vector<128x32xf32>
    %cst_3 = arith.constant dense<0.000000e+00> : vector<16x32xf32>
    %34 = tpu.matmul %32, %33, %cst_3 {dimension_numbers = #tpu.dot_dimension_numbers<[1], [0], [0], [1], [0, 0, 1, 1], [], []>} : vector<16x128xf32>, vector<128x32xf32>, vector<16x32xf32> -> vector<16x32xf32>
    %c0_4 = arith.constant 0 : index
    %c0_5 = arith.constant 0 : index
    %35 = vector.load %arg3[%c0_4, %c0_5] : memref<1x32xf32, #tpu.memory_space<vmem>>, vector<1x32xf32>
    %36 = vector.broadcast %35 : vector<1x32xf32> to vector<16x32xf32>
    %37 = arith.addf %34, %36 : vector<16x32xf32>
    %c0_6 = arith.constant 0 : index
    %c0_7 = arith.constant 0 : index
    %38 = vector.load %arg4[%c0_6, %c0_7] : memref<16x32xf32, #tpu.memory_space<vmem>>, vector<16x32xf32>
    tpu.vector_store %arg4[%c0_6, %c0_7], %37 {strides = array<i32>} : memref<16x32xf32, #tpu.memory_space<vmem>>, vector<16x32xf32>,
    return
  }
  func.func @transform_0(%arg0: i32) -> (i32, i32) {
    %c0_i32 = arith.constant 0 : i32
    %c0_i32_0 = arith.constant 0 : i32
    return %arg0, %c0_i32 : i32, i32
  }
  func.func @transform_1(%arg0: i32) -> (i32, i32) {
    %c0_i32 = arith.constant 0 : i32
    %c0_i32_0 = arith.constant 0 : i32
    %c0_i32_1 = arith.constant 0 : i32
    return %c0_i32, %c0_i32_0 : i32, i32
  }
  func.func @transform_2(%arg0: i32) -> (i32, i32) {
    %c0_i32 = arith.constant 0 : i32
    %c0_i32_0 = arith.constant 0 : i32
    %c0_i32_1 = arith.constant 0 : i32
    return %c0_i32, %c0_i32_0 : i32, i32
  }
  func.func @transform_3(%arg0: i32) -> (i32, i32) {
    %c0_i32 = arith.constant 0 : i32
    %c0_i32_0 = arith.constant 0 : i32
    return %arg0, %c0_i32 : i32, i32
  }
}

</mosaic_0001>

<bundles_post_ra>
// kernel: tpu_custom_call.1
= control target key start
LH: loop header
LB: loop body
LE: loop exit
PB: predicated region body
PF: predicated region fallthrough
CT: control target
= control target key end

     0   :  { %v344_v2 = vmov 0   ;;  %s442_s0 = inlined_call_operand.vmem [shape: s32[16,8], index: 0, kind: input, shape index: {}]   ;;  %s443_s1 = inlined_call_operand.vmem [shape: f32[128,32], index: 1, kind: input, shape index: {}]   ;;  %s444_s2 = inlined_call_operand.vmem [shape: f32[1,32], index: 2, kind: input, shape index: {}]   ;;  %s445_s3 = inlined_call_operand.hbm [shape: f32[16,32], index: 3, kind: output, shape index: {}]  }
   0x1   :  { %v16_v0 = vld [vmem:[%s442_s0 + $0x8] sm:$0xff]  ;;  %v15_v1 = vld [vmem:[%s442_s0] sm:$0xff]  ;;  %313 = vset.pattern.permute.xlu1 %v344_v2  ;;  %311 = vset.pattern.permute.xlu0 %v344_v2  ;;  %v91_v5 = vld [vmem:[%s443_s1 + $0x10] sm:$0xff] }
   0x2   :  { %v89_v3 = vld [vmem:[%s443_s1] sm:$0xff]  ;;  %v90_v4 = vld [vmem:[%s443_s1 + $0x8] sm:$0xff]  ;;  %23 = vperm.xlu1 %313, %v16_v0   ;;  %20 = vperm.xlu0 %311, %v15_v1   ;;  %v92_v7 = vld [vmem:[%s443_s1 + $0x18] sm:$0xff] }
   0x3   :  { %v270_v6 = vpack.c.bf16 %v90_v4, %v89_v3 }
   0x4   :  { %8 = vsyncpa [#allocation3], 0  ;;  %v93_v8 = vld [vmem:[%s443_s1 + $0x20] sm:$0xff]  ;;  %v94_v9 = vld [vmem:[%s443_s1 + $0x28] sm:$0xff]  ;;  %v274_v10 = vpack.c.bf16 %v92_v7, %v91_v5  ;;  %v345_v11 = vmov 1   ;;  %v346_v16 = vmov 2   ;;  %v17_v31 = vlaneseq }
   0x5   :  { %271 = vmatprep.subr.bf16.mxu0 %v270_v6  ;;  %v278_v12 = vpack.c.bf16 %v94_v9, %v93_v8  ;;  %v95_v13 = vld [vmem:[%s443_s1 + $0x30] sm:$0xff]  ;;  %v96_v14 = vld [vmem:[%s443_s1 + $0x38] sm:$0xff]  ;;  %v97_v17 = vld [vmem:[%s443_s1 + $0x40] sm:$0xff]  ;;  %v347_v20 = vmov 3   ;;  %v348_v21 = vmov 4   ;;  %v349_v37 = vmov 0.0  }
   0x6   :  { %273 = vmatpush3.bf16.msra.mxu0 %v270_v6  ;;  %314 = vset.pattern.permute.xlu1 %v345_v11  ;;  %v282_v15 = vpack.c.bf16 %v96_v14, %v95_v13  ;;  %v98_v18 = vld [vmem:[%s443_s1 + $0x48] sm:$0xff]  ;;  %v99_v22 = vld [vmem:[%s443_s1 + $0x50] sm:$0xff]  ;;  %v100_v23 = vld [vmem:[%s443_s1 + $0x58] sm:$0xff]  ;;  %v18_v34 = vand.u32 127, %v17_v31  ;;  %s350_s21 = smov [#allocation2]   ;;  %vm187_vm10 = vcmask 261120  }
   0x7   :  { %312 = vset.pattern.permute.xlu0 %v345_v11  ;;  %37 = vperm.xlu1 %314, %v16_v0   ;;  %v286_v19 = vpack.c.bf16 %v98_v18, %v97_v17  ;;  %v290_v24 = vpack.c.bf16 %v100_v23, %v99_v22  ;;  %v101_v25 = vld [vmem:[%s443_s1 + $0x60] sm:$0xff]  ;;  %v102_v26 = vld [vmem:[%s443_s1 + $0x68] sm:$0xff]  ;;  %v103_v28 = vld [vmem:[%s443_s1 + $0x70] sm:$0xff]  ;;  %s195_s22 = sshll.u32 %s350_s21, 4  ;;  %s196_s22 = int_to_ptr.vmem [resolvable:$true] %s195_s22 }
   0x8   :  { %34 = vperm.xlu0 %312, %v15_v1   ;;  %275 = vmatprep.subr.bf16.mxu0 %v274_v10  ;;  %v294_v27 = vpack.c.bf16 %v102_v26, %v101_v25  ;;  %v104_v29 = vld [vmem:[%s443_s1 + $0x78] sm:$0xff]  ;;  %v216_v62 = vld [vmem:[%s444_s2] ss:$0 sm:$0xff]  ;;  %s320_s0 = scalar_lea.vmem %s196_s22, 256  ;;  %p325_p1 = scmp.lt.s32.totalorder %s196_s22, %s196_s22 }
   0x9   :  { %v298_v30 = vpack.c.bf16 %v104_v29, %v103_v28  ;;  %p321_p0 = scmp.ne.s32.totalorder %s196_s22, %s320_s0  ;;  %p326_p2 = scmp.lt.s32.totalorder %s320_s0, %s320_s0 }
   0xa   :  { %277 = vmatpush3.bf16.msra.mxu0 %v274_v10 }
   0xb   :  { %279 = vmatprep.subr.bf16.mxu0 %v278_v12  ;;  %315 = vset.pattern.permute.xlu1 %v346_v16  ;;  %p327_p3 = por %p326_p2, %p325_p1 }
   0xc   :  { %316 = vset.pattern.permute.xlu0 %v346_v16  ;;  %48 = vperm.xlu1 %315, %v15_v1  }
   0xd   :  { %51 = vperm.xlu0 %316, %v16_v0   ;;  %p328_p4 = pnand %p327_p3, %p321_p0 }
   0xe   :  { %281 = vmatpush3.bf16.msra.mxu0 %v278_v12 }
   0xf   :  { %283 = vmatprep.subr.bf16.mxu0 %v282_v15 }
  0x10   :  { %317 = vset.pattern.permute.xlu1 %v347_v20 }
  0x11   :  { %318 = vset.pattern.permute.xlu0 %v348_v21  ;;  %62 = vperm.xlu1 %317, %v15_v1  }
  0x12   :  { %76 = vperm.xlu0 %318, %v15_v1   ;;  %285 = vmatpush3.bf16.msra.mxu0 %v282_v15 }
  0x13   :  { %287 = vmatprep.subr.bf16.mxu0 %v286_v19 }
  0x15   :  { %65 = vperm.xlu1 %317, %v16_v0  }
  0x16   :  { %289 = vmatpush3.bf16.msra.mxu0 %v286_v19 }
  0x17   :  { %291 = vmatprep.subr.bf16.mxu0 %v290_v24 }
  0x19   :  { %319 = vset.pattern.permute.xlu1 %v348_v21 }
  0x1a   :  { %79 = vperm.xlu1 %319, %v16_v0   ;;  %293 = vmatpush3.bf16.msra.mxu0 %v290_v24 }
  0x1b   :  { %295 = vmatprep.subr.bf16.mxu0 %v294_v27 }
  0x1e   :  { %297 = vmatpush3.bf16.msra.mxu0 %v294_v27 }
  0x1f   :  { %299 = vmatprep.subr.bf16.mxu0 %v298_v30 }
  0x22   :  { %301 = vmatpush3.bf16.msra.mxu0 %v298_v30 }
  0x81   :  { %v24_v32 = vpop.permute.xlu1 %23  ;;  %v21_v33 = vpop.permute.xlu0 %20 }
  0x82   :  { %vm25_vm0 = vcmp.eq.s32.totalorder %v21_v33, %v18_v34  ;;  %vm26_vm6 = vcmp.eq.s32.totalorder %v24_v32, %v18_v34 }
  0x83   :  { %v206_v38 = vsel %vm25_vm0, 1.0, %v349_v37  ;;  %v207_v52 = vsel %vm26_vm6, 1.0, %v349_v37 }
  0x86   :  { %v38_v35 = vpop.permute.xlu1 %37 }
  0x87   :  { %v35_v36 = vpop.permute.xlu0 %34  ;;  %vm40_vm3 = vcmp.eq.s32.totalorder %v38_v35, %v18_v34 }
  0x88   :  { %vm39_vm1 = vcmp.eq.s32.totalorder %v35_v36, %v18_v34  ;;  %v209_v49 = vsel %vm40_vm3, 1.0, %v349_v37 }
  0x89   :  { %v208_v39 = vsel %vm39_vm1, 1.0, %v349_v37  ;;  %v46_v55 = vadd.f32 %v209_v49, %v207_v52 }
  0x8a   :  { %v45_v42 = vadd.f32 %v208_v39, %v206_v38 }
  0x8b   :  { %v49_v40 = vpop.permute.xlu1 %48 }
  0x8c   :  { %vm53_vm2 = vcmp.eq.s32.totalorder %v49_v40, %v18_v34  ;;  %v52_v41 = vpop.permute.xlu0 %51 }
  0x8d   :  { %v210_v43 = vsel %vm53_vm2, 1.0, %v349_v37  ;;  %vm54_vm7 = vcmp.eq.s32.totalorder %v52_v41, %v18_v34 }
  0x8e   :  { %v59_v46 = vadd.f32 %v210_v43, %v45_v42  ;;  %v211_v53 = vsel %vm54_vm7, 1.0, %v349_v37 }
  0x8f   :  { %v60_v57 = vadd.f32 %v211_v53, %v46_v55 }
  0x90   :  { %v63_v44 = vpop.permute.xlu1 %62 }
  0x91   :  { %v77_v45 = vpop.permute.xlu0 %76  ;;  %vm67_vm4 = vcmp.eq.s32.totalorder %v63_v44, %v18_v34 }
  0x92   :  { %vm81_vm5 = vcmp.eq.s32.totalorder %v77_v45, %v18_v34  ;;  %v212_v47 = vsel %vm67_vm4, 1.0, %v349_v37 }
  0x93   :  { %v214_v48 = vsel %vm81_vm5, 1.0, %v349_v37  ;;  %v73_v50 = vadd.f32 %v212_v47, %v59_v46 }
  0x94   :  { %v66_v51 = vpop.permute.xlu1 %65 }
  0x95   :  { %vm68_vm8 = vcmp.eq.s32.totalorder %v66_v51, %v18_v34  ;;  %v87_v54 = vadd.f32 %v214_v48, %v73_v50 }
  0x96   :  { %v213_v56 = vsel %vm68_vm8, 1.0, %v349_v37 }
  0x97   :  { %267 = vmatprep.mubr.f32.mxu0 %v87_v54  ;;  %v74_v59 = vadd.f32 %v213_v56, %v60_v57 }
  0x99   :  { %v80_v58 = vpop.permute.xlu1 %79 }
  0x9a   :  { %vm82_vm9 = vcmp.eq.s32.totalorder %v80_v58, %v18_v34 }
  0x9b   :  { %v215_v60 = vsel %vm82_vm9, 1.0, %v349_v37 }
  0x9c   :  { %v88_v61 = vadd.f32 %v215_v60, %v74_v59 }
  0x9e   :  { %268 = vmatmul.mubr.f32.vlgmr.msra.gmra.mrb[0].mxu0 %v88_v61 }
 0x171   :  { %v269_v63 = vpop.f32.mrb[0].mxu0 }
 0x172   :  { %v184_v0 = vadd.f32 %v269_v63, %v216_v62  ;;  %v178_v1 = vpop.f32.mrb[1].mxu0 }
 0x173   :  { %v179_v2 = vadd.f32 %v216_v62, %v178_v1 }
 0x174   :  { %189 = vst.msk [vmem:[#allocation2 + $0x8] sm:$0xff] %vm187_vm10, %v184_v0 }
 0x175   :  { %188 = vst.msk [vmem:[#allocation2] sm:$0xff] %vm187_vm10, %v179_v2 }
 0x176   :  { %331 = shalt.err (!%p328_p4)
}
 0x177   :  { %s332_s2 = scalar_lea.hbm %s445_s3, 256 }
 0x178   :  { %p333_p5 = scmp.ne.s32.totalorder %s445_s3, %s332_s2  ;;  %p336_p6 = scmp.lt.u32.totalorder %s332_s2, %s445_s3 }
 0x17a   :  { %p338_p7 = pnand %p336_p6, %p333_p5 }
 0x17c   :  { %341 = shalt.err (!%p338_p7)
}
 0x17d   :  { %s351_s29 = smov 128   ;;  %s352_s30 = smov 8  }
 0x17e   :  { %201 = dma.vmem_to_hbm [thread:$0]  %s196_s22, 256, %s445_s3, [#allocation3], %s351_s29, %s351_s29, %s352_s30  }
 0x17f   :  { %342 = dma.done.wait [#allocation3], 256  }
 0x180   :  { %343 = vsyncadd [#allocation3], 4294967040 }
 0x181   :  { %205 = vsyncpa [#allocation3], 1 }

</bundles_post_ra>
